<compile_context>
chip_gen: v5e
topology: v5e:2x2
jax: 0.10.0
libtpu: 0.0.40
codegen_flags: <defaults>
</compile_context>

<pallas_src>
import functools

import jax
import jax.numpy as jnp
from jax.experimental import pallas as pl
from jax.experimental.pallas import tpu as pltpu


def _cbam_kernel(alpha_ref, wsa_ref, wpos_ref, x_ref, w1_ref, w2_ref, o_ref,
                 *, width):
    x = x_ref[...]                                   # (C, HW), native dtype
    HW = x.shape[1]
    xf = x.astype(jnp.float32)

    # ---------------- Channel attention ----------------
    avg = jnp.mean(xf, axis=1, keepdims=True)        # (C, 1) f32
    mx = jnp.max(xf, axis=1, keepdims=True)          # (C, 1) f32
    v = jnp.concatenate([avg, mx], axis=1)           # (C, 2)  [avg | max]

    alpha = alpha_ref[0]                             # PReLU slope (scalar)
    # Both MLP branches share weights -> run them together: 2 matmuls total.
    h = jnp.dot(w1_ref[...], v, preferred_element_type=jnp.float32)    # (C//r, 2)
    h = jnp.where(h >= 0, h, alpha * h)                                 # PReLU
    mlp = jnp.dot(w2_ref[...], h, preferred_element_type=jnp.float32)  # (C, 2)
    ca = jax.nn.sigmoid(jnp.sum(mlp, axis=1, keepdims=True))           # (C, 1)

    x1 = x * ca.astype(x.dtype)                      # (C, HW), native dtype

    # ---------------- Spatial attention ----------------
    x1f = x1.astype(jnp.float32)
    avg_c = jnp.mean(x1f, axis=0, keepdims=True)     # (1, HW)
    max_c = jnp.max(x1f, axis=0, keepdims=True)      # (1, HW)
    sp = jnp.concatenate([avg_c, max_c], axis=0)     # (2, HW) [mean | max]

    K = wsa_ref.shape[1]
    P = (K - 1) // 2
    wpos = wpos_ref[...]                             # (1, HW) int32: w index of each lane

    # 1xK conv along W with 'same' zero padding, as lane rolls + boundary mask.
    conv2 = wsa_ref[:, P:P + 1] * sp                 # center tap, (2, HW)
    for k in range(K):
        if k == P:
            continue
        s = k - P                                    # tap offset along W
        rolled = pltpu.roll(sp, shift=(-s) % HW, axis=1)   # rolled[., i] = sp[., i + s]
        valid = jnp.logical_and(wpos + s >= 0, wpos + s < width)
        conv2 = conv2 + jnp.where(valid, wsa_ref[:, k:k + 1] * rolled, 0.0)
    conv = jnp.sum(conv2, axis=0, keepdims=True)     # (1, HW): mean-row + max-row
    sa = jax.nn.sigmoid(conv)

    o_ref[...] = (x1 * sa.astype(x1.dtype)).astype(o_ref.dtype)


def cbam_pallas(x, w1, w2, alpha, wsa):
    N, C, H, W = x.shape
    HW = H * W
    hidden = w1.shape[0]
    K = wsa.shape[1]

    x_flat = x.reshape(N, C, HW)
    # w-index of every flattened spatial position, precomputed on the wrapper
    # side so the kernel only needs vector compares (no vector int div/mod).
    wpos = jnp.tile(jnp.arange(W, dtype=jnp.int32), H).reshape(1, HW)

    # Explicit VMEM budget: double-buffered in/out blocks + f32 intermediates.
    blk = C * HW * x.dtype.itemsize
    est = 4 * blk + 8 * C * HW * 4 + (2 * hidden * C + 2 * K + HW) * 4 + (2 << 20)
    vmem_limit = int(min(max(est, 32 << 20), 100 << 20))
    # NOTE: for very large C*H*W (v7x has only 64 MiB VMEM) this should be
    # split into a C-tiled stats kernel + apply kernel instead of one
    # monolithic per-batch block.

    kernel = functools.partial(_cbam_kernel, width=W)
    out_flat = pl.pallas_call(
        kernel,
        out_shape=jax.ShapeDtypeStruct((N, C, HW), x.dtype),
        grid=(N,),
        in_specs=[
            pl.BlockSpec(memory_space=pltpu.MemorySpace.SMEM),    # alpha (1,)
            pl.BlockSpec((2, K), lambda n: (0, 0)),               # wsa   (2, K)
            pl.BlockSpec((1, HW), lambda n: (0, 0)),              # wpos  (1, HW)
            pl.BlockSpec((None, C, HW), lambda n: (n, 0, 0)),     # x per-batch block
            pl.BlockSpec((hidden, C), lambda n: (0, 0)),          # w1
            pl.BlockSpec((C, hidden), lambda n: (0, 0)),          # w2
        ],
        out_specs=pl.BlockSpec((None, C, HW), lambda n: (n, 0, 0)),
        compiler_params=pltpu.CompilerParams(
            dimension_semantics=("parallel",),
            vmem_limit_bytes=vmem_limit,
        ),
    )(alpha, wsa, wpos, x_flat, w1, w2)
    return out_flat.reshape(N, C, H, W)


def cbam_ref(x, w1, w2, alpha, wsa):
    """Pure-JAX reference reproducing the PyTorch forward."""
    avg = jnp.mean(x, axis=(2, 3))
    mx = jnp.max(x, axis=(2, 3))

    def mlp(v):
        h = v @ w1.T
        h = jnp.where(h >= 0, h, alpha * h)
        return h @ w2.T

    ca = jax.nn.sigmoid(mlp(avg) + mlp(mx))[:, :, None, None]
    x1 = ca * x
    avg_c = jnp.mean(x1, axis=1, keepdims=True)
    max_c = jnp.max(x1, axis=1, keepdims=True)
    cat = jnp.concatenate([avg_c, max_c], axis=1)
    K = wsa.shape[1]
    P = (K - 1) // 2
    conv = jax.lax.conv_general_dilated(
        cat, wsa[None, :, None, :],
        window_strides=(1, 1), padding=((0, 0), (P, P)),
        dimension_numbers=("NCHW", "OIHW", "NCHW"))
    sa = jax.nn.sigmoid(conv)
    return sa * x1


if __name__ == "__main__":
    key = jax.random.PRNGKey(0)
    kx, k1, k2, k3 = jax.random.split(key, 4)

    N, C, H, W = 2, 4, 16, 16
    ratio = 2
    K = 11

    x = jax.random.normal(kx, (N, C, H, W), jnp.float32)
    # Deterministic synthetic parameters (shapes follow the PyTorch module).
    w1 = jax.random.normal(k1, (C // ratio, C), jnp.float32) * 0.3   # Conv2d(C, C//2, 1).weight
    w2 = jax.random.normal(k2, (C, C // ratio), jnp.float32) * 0.3   # Conv2d(C//2, C, 1).weight
    wsa = jax.random.normal(k3, (2, K), jnp.float32) * 0.3           # Conv2d(2, 1, (1, 11)).weight
    alpha = jnp.array([0.25], jnp.float32)                           # PReLU default init

    out = jax.block_until_ready(cbam_pallas(x, w1, w2, alpha, wsa))
    ref = cbam_ref(x, w1, w2, alpha, wsa)
    assert out.shape == x.shape
    err = float(jnp.max(jnp.abs(out - ref)))
    assert jnp.allclose(out, ref, rtol=1e-4, atol=1e-4), err
    print("KERNEL_OK")
</pallas_src>

<mosaic_0001>
module attributes {stable_mosaic.version = 11 : i64} {
  func.func @_cbam_kernel(%arg0: i32, %arg1: memref<1xf32, #tpu.memory_space<smem>>, %arg2: memref<2x11xf32, #tpu.memory_space<vmem>>, %arg3: memref<1x256xi32, #tpu.memory_space<vmem>>, %arg4: memref<1x4x256xf32, #tpu.memory_space<vmem>>, %arg5: memref<2x4xf32, #tpu.memory_space<vmem>>, %arg6: memref<4x2xf32, #tpu.memory_space<vmem>>, %arg7: memref<1x4x256xf32, #tpu.memory_space<vmem>>) attributes {dimension_semantics = [#tpu.dimension_semantics<parallel>], iteration_bounds = array<i64: 2>, scalar_prefetch = 0 : i64, scratch_operands = 0 : i64, tpu.core_type = #tpu.core_type<tc>, window_params = [{transform_indices = @transform_0, window_bounds = array<i64: 1>}, {pipeline_mode = #tpu.pipeline_mode<synchronous>, transform_indices = @transform_1, window_bounds = array<i64: 2, 11>}, {pipeline_mode = #tpu.pipeline_mode<synchronous>, transform_indices = @transform_2, window_bounds = array<i64: 1, 256>}, {transform_indices = @transform_3, window_bounds = array<i64: 1, 4, 256>}, {pipeline_mode = #tpu.pipeline_mode<synchronous>, transform_indices = @transform_4, window_bounds = array<i64: 2, 4>}, {pipeline_mode = #tpu.pipeline_mode<synchronous>, transform_indices = @transform_5, window_bounds = array<i64: 4, 2>}, {transform_indices = @transform_6, window_bounds = array<i64: 1, 4, 256>}]} {
    %c0 = arith.constant 0 : index
    %c0_0 = arith.constant 0 : index
    %c0_1 = arith.constant 0 : index
    %0 = vector.load %arg4[%c0, %c0_0, %c0_1] : memref<1x4x256xf32, #tpu.memory_space<vmem>>, vector<1x4x256xf32>
    %1 = vector.shape_cast %0 : vector<1x4x256xf32> to vector<4x256xf32>
    %cst = arith.constant dense<0.000000e+00> : vector<4xf32>
    %2 = vector.multi_reduction <add>, %1, %cst [1] : vector<4x256xf32> to vector<4xf32>
    %3 = vector.shape_cast %2 : vector<4xf32> to vector<4x1xf32>
    %cst_2 = arith.constant 2.560000e+02 : f32
    %4 = vector.broadcast %cst_2 : f32 to vector<4x1xf32>
    %5 = arith.divf %3, %4 : vector<4x1xf32>
    %cst_3 = arith.constant dense<0xFF800000> : vector<4xf32>
    %6 = vector.multi_reduction <maximumf>, %1, %cst_3 [1] : vector<4x256xf32> to vector<4xf32>
    %7 = vector.shape_cast %6 : vector<4xf32> to vector<4x1xf32>
    %8 = tpu.concatenate %5, %7 in 1 : vector<4x1xf32>, vector<4x1xf32> -> vector<4x2xf32>
    %c0_4 = arith.constant 0 : index
    %9 = memref.load %arg1[%c0_4] : memref<1xf32, #tpu.memory_space<smem>>
    %c0_5 = arith.constant 0 : index
    %c0_6 = arith.constant 0 : index
    %10 = vector.load %arg5[%c0_5, %c0_6] : memref<2x4xf32, #tpu.memory_space<vmem>>, vector<2x4xf32>
    %cst_7 = arith.constant dense<0.000000e+00> : vector<2x2xf32>
    %11 = tpu.matmul %10, %8, %cst_7 {dimension_numbers = #tpu.dot_dimension_numbers<[1], [0], [0], [1], [0, 0, 1, 1], [], []>} : vector<2x4xf32>, vector<4x2xf32>, vector<2x2xf32> -> vector<2x2xf32>
    %cst_8 = arith.constant 0.000000e+00 : f32
    %12 = vector.broadcast %cst_8 : f32 to vector<2x2xf32>
    %13 = arith.cmpf oge, %11, %12 : vector<2x2xf32>
    %14 = vector.broadcast %9 : f32 to vector<2x2xf32>
    %15 = arith.mulf %14, %11 : vector<2x2xf32>
    %16 = arith.select %13, %11, %15 : vector<2x2xi1>, vector<2x2xf32>
    %c0_9 = arith.constant 0 : index
    %c0_10 = arith.constant 0 : index
    %17 = vector.load %arg6[%c0_9, %c0_10] : memref<4x2xf32, #tpu.memory_space<vmem>>, vector<4x2xf32>
    %cst_11 = arith.constant dense<0.000000e+00> : vector<4x2xf32>
    %18 = tpu.matmul %17, %16, %cst_11 {dimension_numbers = #tpu.dot_dimension_numbers<[1], [0], [0], [1], [0, 0, 1, 1], [], []>} : vector<4x2xf32>, vector<2x2xf32>, vector<4x2xf32> -> vector<4x2xf32>
    %cst_12 = arith.constant dense<0.000000e+00> : vector<4xf32>
    %19 = vector.multi_reduction <add>, %18, %cst_12 [1] : vector<4x2xf32> to vector<4xf32>
    %20 = vector.shape_cast %19 : vector<4xf32> to vector<4x1xf32>
    %21 = arith.negf %20 : vector<4x1xf32>
    %22 = math.exp %21 : vector<4x1xf32>
    %cst_13 = arith.constant 1.000000e+00 : f32
    %23 = vector.broadcast %cst_13 : f32 to vector<4x1xf32>
    %24 = arith.addf %23, %22 : vector<4x1xf32>
    %25 = arith.divf %23, %24 : vector<4x1xf32>
    %26 = vector.broadcast %25 : vector<4x1xf32> to vector<4x256xf32>
    %27 = arith.mulf %1, %26 : vector<4x256xf32>
    %cst_14 = arith.constant dense<0.000000e+00> : vector<256xf32>
    %28 = vector.multi_reduction <add>, %27, %cst_14 [0] : vector<4x256xf32> to vector<256xf32>
    %29 = vector.shape_cast %28 : vector<256xf32> to vector<1x256xf32>
    %cst_15 = arith.constant 4.000000e+00 : f32
    %30 = vector.broadcast %cst_15 : f32 to vector<1x256xf32>
    %31 = arith.divf %29, %30 : vector<1x256xf32>
    %cst_16 = arith.constant dense<0xFF800000> : vector<256xf32>
    %32 = vector.multi_reduction <maximumf>, %27, %cst_16 [0] : vector<4x256xf32> to vector<256xf32>
    %33 = vector.shape_cast %32 : vector<256xf32> to vector<1x256xf32>
    %34 = tpu.concatenate %31, %33 in 0 : vector<1x256xf32>, vector<1x256xf32> -> vector<2x256xf32>
    %c0_17 = arith.constant 0 : index
    %c0_18 = arith.constant 0 : index
    %35 = vector.load %arg3[%c0_17, %c0_18] : memref<1x256xi32, #tpu.memory_space<vmem>>, vector<1x256xi32>
    %c0_19 = arith.constant 0 : index
    %c5 = arith.constant 5 : index
    %36 = vector.load %arg2[%c0_19, %c5] : memref<2x11xf32, #tpu.memory_space<vmem>>, vector<2x1xf32>
    %37 = vector.broadcast %36 : vector<2x1xf32> to vector<2x256xf32>
    %38 = arith.mulf %37, %34 : vector<2x256xf32>
    %c5_i32 = arith.constant 5 : i32
    %39 = tpu.dynamic_rotate %34 by %c5_i32 dim 1 : vector<2x256xf32>, i32 -> vector<2x256xf32>
    %c-5_i32 = arith.constant -5 : i32
    %40 = vector.broadcast %c-5_i32 : i32 to vector<1x256xi32>
    %41 = arith.addi %35, %40 : vector<1x256xi32>
    %c0_i32 = arith.constant 0 : i32
    %42 = vector.broadcast %c0_i32 : i32 to vector<1x256xi32>
    %43 = arith.cmpi sge, %41, %42 : vector<1x256xi32>
    %c-5_i32_20 = arith.constant -5 : i32
    %44 = vector.broadcast %c-5_i32_20 : i32 to vector<1x256xi32>
    %45 = arith.addi %35, %44 : vector<1x256xi32>
    %c16_i32 = arith.constant 16 : i32
    %46 = vector.broadcast %c16_i32 : i32 to vector<1x256xi32>
    %47 = arith.cmpi slt, %45, %46 : vector<1x256xi32>
    %48 = arith.andi %43, %47 : vector<1x256xi1>
    %c0_21 = arith.constant 0 : index
    %c0_22 = arith.constant 0 : index
    %49 = vector.load %arg2[%c0_21, %c0_22] : memref<2x11xf32, #tpu.memory_space<vmem>>, vector<2x1xf32>
    %50 = vector.broadcast %49 : vector<2x1xf32> to vector<2x256xf32>
    %51 = arith.mulf %50, %39 : vector<2x256xf32>
    %cst_23 = arith.constant 0.000000e+00 : f32
    %52 = vector.shape_cast %48 : vector<1x256xi1> to vector<1x256xi1>
    %53 = vector.broadcast %52 : vector<1x256xi1> to vector<2x256xi1>
    %54 = vector.broadcast %cst_23 : f32 to vector<2x256xf32>
    %55 = arith.select %53, %51, %54 : vector<2x256xi1>, vector<2x256xf32>
    %56 = arith.addf %38, %55 : vector<2x256xf32>
    %c4_i32 = arith.constant 4 : i32
    %57 = tpu.dynamic_rotate %34 by %c4_i32 dim 1 : vector<2x256xf32>, i32 -> vector<2x256xf32>
    %c-4_i32 = arith.constant -4 : i32
    %58 = vector.broadcast %c-4_i32 : i32 to vector<1x256xi32>
    %59 = arith.addi %35, %58 : vector<1x256xi32>
    %c0_i32_24 = arith.constant 0 : i32
    %60 = vector.broadcast %c0_i32_24 : i32 to vector<1x256xi32>
    %61 = arith.cmpi sge, %59, %60 : vector<1x256xi32>
    %c-4_i32_25 = arith.constant -4 : i32
    %62 = vector.broadcast %c-4_i32_25 : i32 to vector<1x256xi32>
    %63 = arith.addi %35, %62 : vector<1x256xi32>
    %c16_i32_26 = arith.constant 16 : i32
    %64 = vector.broadcast %c16_i32_26 : i32 to vector<1x256xi32>
    %65 = arith.cmpi slt, %63, %64 : vector<1x256xi32>
    %66 = arith.andi %61, %65 : vector<1x256xi1>
    %c0_27 = arith.constant 0 : index
    %c1 = arith.constant 1 : index
    %67 = vector.load %arg2[%c0_27, %c1] : memref<2x11xf32, #tpu.memory_space<vmem>>, vector<2x1xf32>
    %68 = vector.broadcast %67 : vector<2x1xf32> to vector<2x256xf32>
    %69 = arith.mulf %68, %57 : vector<2x256xf32>
    %cst_28 = arith.constant 0.000000e+00 : f32
    %70 = vector.shape_cast %66 : vector<1x256xi1> to vector<1x256xi1>
    %71 = vector.broadcast %70 : vector<1x256xi1> to vector<2x256xi1>
    %72 = vector.broadcast %cst_28 : f32 to vector<2x256xf32>
    %73 = arith.select %71, %69, %72 : vector<2x256xi1>, vector<2x256xf32>
    %74 = arith.addf %56, %73 : vector<2x256xf32>
    %c3_i32 = arith.constant 3 : i32
    %75 = tpu.dynamic_rotate %34 by %c3_i32 dim 1 : vector<2x256xf32>, i32 -> vector<2x256xf32>
    %c-3_i32 = arith.constant -3 : i32
    %76 = vector.broadcast %c-3_i32 : i32 to vector<1x256xi32>
    %77 = arith.addi %35, %76 : vector<1x256xi32>
    %c0_i32_29 = arith.constant 0 : i32
    %78 = vector.broadcast %c0_i32_29 : i32 to vector<1x256xi32>
    %79 = arith.cmpi sge, %77, %78 : vector<1x256xi32>
    %c-3_i32_30 = arith.constant -3 : i32
    %80 = vector.broadcast %c-3_i32_30 : i32 to vector<1x256xi32>
    %81 = arith.addi %35, %80 : vector<1x256xi32>
    %c16_i32_31 = arith.constant 16 : i32
    %82 = vector.broadcast %c16_i32_31 : i32 to vector<1x256xi32>
    %83 = arith.cmpi slt, %81, %82 : vector<1x256xi32>
    %84 = arith.andi %79, %83 : vector<1x256xi1>
    %c0_32 = arith.constant 0 : index
    %c2 = arith.constant 2 : index
    %85 = vector.load %arg2[%c0_32, %c2] : memref<2x11xf32, #tpu.memory_space<vmem>>, vector<2x1xf32>
    %86 = vector.broadcast %85 : vector<2x1xf32> to vector<2x256xf32>
    %87 = arith.mulf %86, %75 : vector<2x256xf32>
    %cst_33 = arith.constant 0.000000e+00 : f32
    %88 = vector.shape_cast %84 : vector<1x256xi1> to vector<1x256xi1>
    %89 = vector.broadcast %88 : vector<1x256xi1> to vector<2x256xi1>
    %90 = vector.broadcast %cst_33 : f32 to vector<2x256xf32>
    %91 = arith.select %89, %87, %90 : vector<2x256xi1>, vector<2x256xf32>
    %92 = arith.addf %74, %91 : vector<2x256xf32>
    %c2_i32 = arith.constant 2 : i32
    %93 = tpu.dynamic_rotate %34 by %c2_i32 dim 1 : vector<2x256xf32>, i32 -> vector<2x256xf32>
    %c-2_i32 = arith.constant -2 : i32
    %94 = vector.broadcast %c-2_i32 : i32 to vector<1x256xi32>
    %95 = arith.addi %35, %94 : vector<1x256xi32>
    %c0_i32_34 = arith.constant 0 : i32
    %96 = vector.broadcast %c0_i32_34 : i32 to vector<1x256xi32>
    %97 = arith.cmpi sge, %95, %96 : vector<1x256xi32>
    %c-2_i32_35 = arith.constant -2 : i32
    %98 = vector.broadcast %c-2_i32_35 : i32 to vector<1x256xi32>
    %99 = arith.addi %35, %98 : vector<1x256xi32>
    %c16_i32_36 = arith.constant 16 : i32
    %100 = vector.broadcast %c16_i32_36 : i32 to vector<1x256xi32>
    %101 = arith.cmpi slt, %99, %100 : vector<1x256xi32>
    %102 = arith.andi %97, %101 : vector<1x256xi1>
    %c0_37 = arith.constant 0 : index
    %c3 = arith.constant 3 : index
    %103 = vector.load %arg2[%c0_37, %c3] : memref<2x11xf32, #tpu.memory_space<vmem>>, vector<2x1xf32>
    %104 = vector.broadcast %103 : vector<2x1xf32> to vector<2x256xf32>
    %105 = arith.mulf %104, %93 : vector<2x256xf32>
    %cst_38 = arith.constant 0.000000e+00 : f32
    %106 = vector.shape_cast %102 : vector<1x256xi1> to vector<1x256xi1>
    %107 = vector.broadcast %106 : vector<1x256xi1> to vector<2x256xi1>
    %108 = vector.broadcast %cst_38 : f32 to vector<2x256xf32>
    %109 = arith.select %107, %105, %108 : vector<2x256xi1>, vector<2x256xf32>
    %110 = arith.addf %92, %109 : vector<2x256xf32>
    %c1_i32 = arith.constant 1 : i32
    %111 = tpu.dynamic_rotate %34 by %c1_i32 dim 1 : vector<2x256xf32>, i32 -> vector<2x256xf32>
    %c-1_i32 = arith.constant -1 : i32
    %112 = vector.broadcast %c-1_i32 : i32 to vector<1x256xi32>
    %113 = arith.addi %35, %112 : vector<1x256xi32>
    %c0_i32_39 = arith.constant 0 : i32
    %114 = vector.broadcast %c0_i32_39 : i32 to vector<1x256xi32>
    %115 = arith.cmpi sge, %113, %114 : vector<1x256xi32>
    %c-1_i32_40 = arith.constant -1 : i32
    %116 = vector.broadcast %c-1_i32_40 : i32 to vector<1x256xi32>
    %117 = arith.addi %35, %116 : vector<1x256xi32>
    %c16_i32_41 = arith.constant 16 : i32
    %118 = vector.broadcast %c16_i32_41 : i32 to vector<1x256xi32>
    %119 = arith.cmpi slt, %117, %118 : vector<1x256xi32>
    %120 = arith.andi %115, %119 : vector<1x256xi1>
    %c0_42 = arith.constant 0 : index
    %c4 = arith.constant 4 : index
    %121 = vector.load %arg2[%c0_42, %c4] : memref<2x11xf32, #tpu.memory_space<vmem>>, vector<2x1xf32>
    %122 = vector.broadcast %121 : vector<2x1xf32> to vector<2x256xf32>
    %123 = arith.mulf %122, %111 : vector<2x256xf32>
    %cst_43 = arith.constant 0.000000e+00 : f32
    %124 = vector.shape_cast %120 : vector<1x256xi1> to vector<1x256xi1>
    %125 = vector.broadcast %124 : vector<1x256xi1> to vector<2x256xi1>
    %126 = vector.broadcast %cst_43 : f32 to vector<2x256xf32>
    %127 = arith.select %125, %123, %126 : vector<2x256xi1>, vector<2x256xf32>
    %128 = arith.addf %110, %127 : vector<2x256xf32>
    %c255_i32 = arith.constant 255 : i32
    %129 = tpu.dynamic_rotate %34 by %c255_i32 dim 1 : vector<2x256xf32>, i32 -> vector<2x256xf32>
    %c1_i32_44 = arith.constant 1 : i32
    %130 = vector.broadcast %c1_i32_44 : i32 to vector<1x256xi32>
    %131 = arith.addi %35, %130 : vector<1x256xi32>
    %c0_i32_45 = arith.constant 0 : i32
    %132 = vector.broadcast %c0_i32_45 : i32 to vector<1x256xi32>
    %133 = arith.cmpi sge, %131, %132 : vector<1x256xi32>
    %c1_i32_46 = arith.constant 1 : i32
    %134 = vector.broadcast %c1_i32_46 : i32 to vector<1x256xi32>
    %135 = arith.addi %35, %134 : vector<1x256xi32>
    %c16_i32_47 = arith.constant 16 : i32
    %136 = vector.broadcast %c16_i32_47 : i32 to vector<1x256xi32>
    %137 = arith.cmpi slt, %135, %136 : vector<1x256xi32>
    %138 = arith.andi %133, %137 : vector<1x256xi1>
    %c0_48 = arith.constant 0 : index
    %c6 = arith.constant 6 : index
    %139 = vector.load %arg2[%c0_48, %c6] : memref<2x11xf32, #tpu.memory_space<vmem>>, vector<2x1xf32>
    %140 = vector.broadcast %139 : vector<2x1xf32> to vector<2x256xf32>
    %141 = arith.mulf %140, %129 : vector<2x256xf32>
    %cst_49 = arith.constant 0.000000e+00 : f32
    %142 = vector.shape_cast %138 : vector<1x256xi1> to vector<1x256xi1>
    %143 = vector.broadcast %142 : vector<1x256xi1> to vector<2x256xi1>
    %144 = vector.broadcast %cst_49 : f32 to vector<2x256xf32>
    %145 = arith.select %143, %141, %144 : vector<2x256xi1>, vector<2x256xf32>
    %146 = arith.addf %128, %145 : vector<2x256xf32>
    %c254_i32 = arith.constant 254 : i32
    %147 = tpu.dynamic_rotate %34 by %c254_i32 dim 1 : vector<2x256xf32>, i32 -> vector<2x256xf32>
    %c2_i32_50 = arith.constant 2 : i32
    %148 = vector.broadcast %c2_i32_50 : i32 to vector<1x256xi32>
    %149 = arith.addi %35, %148 : vector<1x256xi32>
    %c0_i32_51 = arith.constant 0 : i32
    %150 = vector.broadcast %c0_i32_51 : i32 to vector<1x256xi32>
    %151 = arith.cmpi sge, %149, %150 : vector<1x256xi32>
    %c2_i32_52 = arith.constant 2 : i32
    %152 = vector.broadcast %c2_i32_52 : i32 to vector<1x256xi32>
    %153 = arith.addi %35, %152 : vector<1x256xi32>
    %c16_i32_53 = arith.constant 16 : i32
    %154 = vector.broadcast %c16_i32_53 : i32 to vector<1x256xi32>
    %155 = arith.cmpi slt, %153, %154 : vector<1x256xi32>
    %156 = arith.andi %151, %155 : vector<1x256xi1>
    %c0_54 = arith.constant 0 : index
    %c7 = arith.constant 7 : index
    %157 = vector.load %arg2[%c0_54, %c7] : memref<2x11xf32, #tpu.memory_space<vmem>>, vector<2x1xf32>
    %158 = vector.broadcast %157 : vector<2x1xf32> to vector<2x256xf32>
    %159 = arith.mulf %158, %147 : vector<2x256xf32>
    %cst_55 = arith.constant 0.000000e+00 : f32
    %160 = vector.shape_cast %156 : vector<1x256xi1> to vector<1x256xi1>
    %161 = vector.broadcast %160 : vector<1x256xi1> to vector<2x256xi1>
    %162 = vector.broadcast %cst_55 : f32 to vector<2x256xf32>
    %163 = arith.select %161, %159, %162 : vector<2x256xi1>, vector<2x256xf32>
    %164 = arith.addf %146, %163 : vector<2x256xf32>
    %c253_i32 = arith.constant 253 : i32
    %165 = tpu.dynamic_rotate %34 by %c253_i32 dim 1 : vector<2x256xf32>, i32 -> vector<2x256xf32>
    %c3_i32_56 = arith.constant 3 : i32
    %166 = vector.broadcast %c3_i32_56 : i32 to vector<1x256xi32>
    %167 = arith.addi %35, %166 : vector<1x256xi32>
    %c0_i32_57 = arith.constant 0 : i32
    %168 = vector.broadcast %c0_i32_57 : i32 to vector<1x256xi32>
    %169 = arith.cmpi sge, %167, %168 : vector<1x256xi32>
    %c3_i32_58 = arith.constant 3 : i32
    %170 = vector.broadcast %c3_i32_58 : i32 to vector<1x256xi32>
    %171 = arith.addi %35, %170 : vector<1x256xi32>
    %c16_i32_59 = arith.constant 16 : i32
    %172 = vector.broadcast %c16_i32_59 : i32 to vector<1x256xi32>
    %173 = arith.cmpi slt, %171, %172 : vector<1x256xi32>
    %174 = arith.andi %169, %173 : vector<1x256xi1>
    %c0_60 = arith.constant 0 : index
    %c8 = arith.constant 8 : index
    %175 = vector.load %arg2[%c0_60, %c8] : memref<2x11xf32, #tpu.memory_space<vmem>>, vector<2x1xf32>
    %176 = vector.broadcast %175 : vector<2x1xf32> to vector<2x256xf32>
    %177 = arith.mulf %176, %165 : vector<2x256xf32>
    %cst_61 = arith.constant 0.000000e+00 : f32
    %178 = vector.shape_cast %174 : vector<1x256xi1> to vector<1x256xi1>
    %179 = vector.broadcast %178 : vector<1x256xi1> to vector<2x256xi1>
    %180 = vector.broadcast %cst_61 : f32 to vector<2x256xf32>
    %181 = arith.select %179, %177, %180 : vector<2x256xi1>, vector<2x256xf32>
    %182 = arith.addf %164, %181 : vector<2x256xf32>
    %c252_i32 = arith.constant 252 : i32
    %183 = tpu.dynamic_rotate %34 by %c252_i32 dim 1 : vector<2x256xf32>, i32 -> vector<2x256xf32>
    %c4_i32_62 = arith.constant 4 : i32
    %184 = vector.broadcast %c4_i32_62 : i32 to vector<1x256xi32>
    %185 = arith.addi %35, %184 : vector<1x256xi32>
    %c0_i32_63 = arith.constant 0 : i32
    %186 = vector.broadcast %c0_i32_63 : i32 to vector<1x256xi32>
    %187 = arith.cmpi sge, %185, %186 : vector<1x256xi32>
    %c4_i32_64 = arith.constant 4 : i32
    %188 = vector.broadcast %c4_i32_64 : i32 to vector<1x256xi32>
    %189 = arith.addi %35, %188 : vector<1x256xi32>
    %c16_i32_65 = arith.constant 16 : i32
    %190 = vector.broadcast %c16_i32_65 : i32 to vector<1x256xi32>
    %191 = arith.cmpi slt, %189, %190 : vector<1x256xi32>
    %192 = arith.andi %187, %191 : vector<1x256xi1>
    %c0_66 = arith.constant 0 : index
    %c9 = arith.constant 9 : index
    %193 = vector.load %arg2[%c0_66, %c9] : memref<2x11xf32, #tpu.memory_space<vmem>>, vector<2x1xf32>
    %194 = vector.broadcast %193 : vector<2x1xf32> to vector<2x256xf32>
    %195 = arith.mulf %194, %183 : vector<2x256xf32>
    %cst_67 = arith.constant 0.000000e+00 : f32
    %196 = vector.shape_cast %192 : vector<1x256xi1> to vector<1x256xi1>
    %197 = vector.broadcast %196 : vector<1x256xi1> to vector<2x256xi1>
    %198 = vector.broadcast %cst_67 : f32 to vector<2x256xf32>
    %199 = arith.select %197, %195, %198 : vector<2x256xi1>, vector<2x256xf32>
    %200 = arith.addf %182, %199 : vector<2x256xf32>
    %c251_i32 = arith.constant 251 : i32
    %201 = tpu.dynamic_rotate %34 by %c251_i32 dim 1 : vector<2x256xf32>, i32 -> vector<2x256xf32>
    %c5_i32_68 = arith.constant 5 : i32
    %202 = vector.broadcast %c5_i32_68 : i32 to vector<1x256xi32>
    %203 = arith.addi %35, %202 : vector<1x256xi32>
    %c0_i32_69 = arith.constant 0 : i32
    %204 = vector.broadcast %c0_i32_69 : i32 to vector<1x256xi32>
    %205 = arith.cmpi sge, %203, %204 : vector<1x256xi32>
    %c5_i32_70 = arith.constant 5 : i32
    %206 = vector.broadcast %c5_i32_70 : i32 to vector<1x256xi32>
    %207 = arith.addi %35, %206 : vector<1x256xi32>
    %c16_i32_71 = arith.constant 16 : i32
    %208 = vector.broadcast %c16_i32_71 : i32 to vector<1x256xi32>
    %209 = arith.cmpi slt, %207, %208 : vector<1x256xi32>
    %210 = arith.andi %205, %209 : vector<1x256xi1>
    %c0_72 = arith.constant 0 : index
    %c10 = arith.constant 10 : index
    %211 = vector.load %arg2[%c0_72, %c10] : memref<2x11xf32, #tpu.memory_space<vmem>>, vector<2x1xf32>
    %212 = vector.broadcast %211 : vector<2x1xf32> to vector<2x256xf32>
    %213 = arith.mulf %212, %201 : vector<2x256xf32>
    %cst_73 = arith.constant 0.000000e+00 : f32
    %214 = vector.shape_cast %210 : vector<1x256xi1> to vector<1x256xi1>
    %215 = vector.broadcast %214 : vector<1x256xi1> to vector<2x256xi1>
    %216 = vector.broadcast %cst_73 : f32 to vector<2x256xf32>
    %217 = arith.select %215, %213, %216 : vector<2x256xi1>, vector<2x256xf32>
    %218 = arith.addf %200, %217 : vector<2x256xf32>
    %cst_74 = arith.constant dense<0.000000e+00> : vector<256xf32>
    %219 = vector.multi_reduction <add>, %218, %cst_74 [0] : vector<2x256xf32> to vector<256xf32>
    %220 = vector.shape_cast %219 : vector<256xf32> to vector<1x256xf32>
    %221 = arith.negf %220 : vector<1x256xf32>
    %222 = math.exp %221 : vector<1x256xf32>
    %cst_75 = arith.constant 1.000000e+00 : f32
    %223 = vector.broadcast %cst_75 : f32 to vector<1x256xf32>
    %224 = arith.addf %223, %222 : vector<1x256xf32>
    %225 = arith.divf %223, %224 : vector<1x256xf32>
    %226 = vector.broadcast %225 : vector<1x256xf32> to vector<4x256xf32>
    %227 = arith.mulf %27, %226 : vector<4x256xf32>
    %c0_76 = arith.constant 0 : index
    %c0_77 = arith.constant 0 : index
    %c0_78 = arith.constant 0 : index
    %228 = vector.load %arg7[%c0_76, %c0_77, %c0_78] : memref<1x4x256xf32, #tpu.memory_space<vmem>>, vector<1x4x256xf32>
    %229 = vector.shape_cast %228 : vector<1x4x256xf32> to vector<4x256xf32>
    %230 = vector.shape_cast %227 : vector<4x256xf32> to vector<1x4x256xf32>
    tpu.vector_store %arg7[%c0_76, %c0_77, %c0_78], %230 {strides = array<i32>} : memref<1x4x256xf32, #tpu.memory_space<vmem>>, vector<1x4x256xf32>,
    return
  }
  func.func @transform_0(%arg0: i32) -> i32 {
    %c0_i32 = arith.constant 0 : i32
    %c0_i32_0 = arith.constant 0 : i32
    return %c0_i32 : i32
  }
  func.func @transform_1(%arg0: i32) -> (i32, i32) {
    %c0_i32 = arith.constant 0 : i32
    %c0_i32_0 = arith.constant 0 : i32
    %c0_i32_1 = arith.constant 0 : i32
    return %c0_i32, %c0_i32_0 : i32, i32
  }
  func.func @transform_2(%arg0: i32) -> (i32, i32) {
    %c0_i32 = arith.constant 0 : i32
    %c0_i32_0 = arith.constant 0 : i32
    %c0_i32_1 = arith.constant 0 : i32
    return %c0_i32, %c0_i32_0 : i32, i32
  }
  func.func @transform_3(%arg0: i32) -> (i32, i32, i32) {
    %c0_i32 = arith.constant 0 : i32
    %c0_i32_0 = arith.constant 0 : i32
    %c0_i32_1 = arith.constant 0 : i32
    return %arg0, %c0_i32, %c0_i32_0 : i32, i32, i32
  }
  func.func @transform_4(%arg0: i32) -> (i32, i32) {
    %c0_i32 = arith.constant 0 : i32
    %c0_i32_0 = arith.constant 0 : i32
    %c0_i32_1 = arith.constant 0 : i32
    return %c0_i32, %c0_i32_0 : i32, i32
  }
  func.func @transform_5(%arg0: i32) -> (i32, i32) {
    %c0_i32 = arith.constant 0 : i32
    %c0_i32_0 = arith.constant 0 : i32
    %c0_i32_1 = arith.constant 0 : i32
    return %c0_i32, %c0_i32_0 : i32, i32
  }
  func.func @transform_6(%arg0: i32) -> (i32, i32, i32) {
    %c0_i32 = arith.constant 0 : i32
    %c0_i32_0 = arith.constant 0 : i32
    %c0_i32_1 = arith.constant 0 : i32
    return %arg0, %c0_i32, %c0_i32_0 : i32, i32, i32
  }
}

</mosaic_0001>

<bundles_post_ra>
// kernel: tpu_custom_call.1
= control target key start
LH: loop header
LB: loop body
LE: loop exit
PB: predicated region body
PF: predicated region fallthrough
CT: control target
= control target key end

     0   :  { %s1571_s0 = inlined_call_operand.<no memory space> [shape: f32[1], index: 0, kind: input, shape index: {}]   ;;  %s1572_s1 = inlined_call_operand.vmem [shape: f32[2,11], index: 1, kind: input, shape index: {}]   ;;  %s1573_s2 = inlined_call_operand.vmem [shape: s32[1,256], index: 2, kind: input, shape index: {}]   ;;  %s1574_s3 = inlined_call_operand.hbm [shape: f32[2,4,256], index: 3, kind: input, shape index: {}]   ;;  %s1575_s4 = inlined_call_operand.vmem [shape: f32[2,4], index: 4, kind: input, shape index: {}]   ;;  %s1576_s5 = inlined_call_operand.vmem [shape: f32[4,2], index: 5, kind: input, shape index: {}]   ;;  %s1577_s6 = inlined_call_operand.hbm [shape: f32[2,4,256], index: 6, kind: output, shape index: {}]  }
   0x1   :  { %11 = sst [smem:[#allocation2]] %s1571_s0 }
   0x2   :  { %12 = vsyncpa [#allocation4], 0 }
   0x3   :  { %14 = vsyncpa [#allocation4 + $0x1], 0 }
   0x4   :  { %15 = vsyncpa [#allocation5], 0 }
   0x5   :  { %17 = vsyncpa [#allocation5 + $0x1], 0  ;;  %s1145_s23 = smov 0   ;;  %s1147_s24 = smov 0  }
   0x6   :  { %s1149_s25 = smov 0   ;;  %s1151_s26 = smov 0  }
   0x7 LB: > { %s1166_s0 = sadd.s32 4294967295, %s1081_s26   ;;  %s864_s27 = sadd.s32 4294967294, %s1081_s26   ;;  %s1081_s26 = sphi %s1151_s26, %s1627_s26   ;;  %s1077_s25 = sphi %s1149_s25, %s1626_s25   ;;  %s1073_s24 = sphi %s1147_s24, %s1625_s24   ;;  %s1069_s23 = sphi %s1145_s23, %s1624_s23  }
   0x8   : > { %s1170_s28 = sadd.s32 1, %s1081_s26   ;;  %s93_s29 = sadd.s32 1, %s1077_s25 }
   0x9   : > { %s90_s30 = ssub.s32 %s1081_s26, %s1170_s28  ;;  %p100_p0 = scmp.ne.s32.totalorder %s1077_s25, %s1073_s24 }
   0xa   : > { %p91_p1 = scmp.eq.s32.totalorder %s90_s30, 0  ;;  %p101_p2 = scmp.eq.s32.totalorder %s1081_s26, 0 }
   0xb   : > { %p106_p3 = scmp.ne.s32.totalorder %s1073_s24, %s1069_s23  ;;  %p107_p4 = scmp.eq.s32.totalorder %s1166_s0, 0 }
   0xc   : > { %s1182_s7 = scalar_select %p91_p1, %s1077_s25, %s93_s29  }
   0xd   : > { %p1184_p5 = por %p101_p2, %p100_p0  ;;  %p1188_p6 = por %p107_p4, %p106_p3 }
   0xe   : > { %p172_p7 = scmp.eq.s32.totalorder %s1166_s0, 1  ;;  %p178_p8 = scmp.eq.s32.totalorder %s864_s27, 1 }
   0xf   : > { %p899_p10 = scmp.lt.s32.totalorder %s1081_s26, 2  ;;  %s213_s12 = sand.u32 1, %s1077_s25  }
  0x10   : > { %p1195_p11 = por %p172_p7, %p100_p0  ;;  %p1199_p12 = por %p178_p8, %p106_p3 }
  0x11   : > { %s885_s13 = sshll.u32 %s1081_s26, 3  ;;  %s867_s14 = sshll.u32 %s213_s12, 3 }
  0x12   : > { %s222_s17 = scalar_lea.hbm %s1574_s3, %s885_s13  ;;  %s217_s19 = scalar_lea.vmem [#allocation3], %s867_s14 }
  0x13   : > { %s224_s18 = sshll.u32 %s222_s17, 4  ;;  %s226_s20 = sshll.u32 %s217_s19, 4  ;;  %s225_s18 = int_to_ptr.hbm [resolvable:$true] %s224_s18  ;;  %s227_s20 = int_to_ptr.vmem [resolvable:$true] %s226_s20 }
  0x14   : > { %p1210_p13 = pnand %p899_p10, %p1184_p5  ;;  %p870_p0 = scmp.ge.s32.totalorder %s1081_s26, 1 }
  0x15   : > { %p231_p1 = scmp.lt.s32.totalorder %s1081_s26, 3  ;;  %s214_s22 = scalar_lea.sflag [#allocation4], %s213_s12 }
  0x16   : > { %s985_s27 = sshra.s32 %s225_s18, 4  ;;  %p989_p3 = pneg %p1210_p13  ;;  %s986_s27 = int_to_ptr.hbm [resolvable:$true] %s985_s27 }
  0x17   : > { %s987_s29 = scalar_lea.hbm %s986_s27, 8  ;;  %s992_s8 = scalar_lea.hbm %s1574_s3, 16 }
  0x18   : > { %p988_p2 = scmp.ne.s32.totalorder %s986_s27, %s987_s29  ;;  %p993_p5 = scmp.lt.s32.totalorder %s986_s27, %s1574_s3 }
  0x19   : > { %p994_p8 = scmp.lt.s32.totalorder %s992_s8, %s987_s29 }
  0x1a   : > { %p990_p4 = pnand %p989_p3, %p988_p2 }
  0x1b   : > { %p995_p10 = por %p994_p8, %p993_p5 }
  0x1c   : > { %p991_p7 = pneg %p990_p4 }
  0x1e   : > { %p996_p9 = pnand %p995_p10, %p991_p7 }
  0x20   : > { %999 = shalt.err (!%p996_p9)
}
  0x21   : > { %894 = dma.hbm_to_vmem [thread:$0]  (!%p1210_p13), %s225_s18, 128, %s227_s20, %s214_s22  }
  0x22   : > { %p232_p2 = pnand %p870_p0, %p231_p1 }
  0x23   : > { %s1231_s12 = sand.u32 (!%p232_p2), 1, %s1073_s24  }
  0x24   : > { %235 = sbr.rel (%p232_p2) target bundleno = 842 (0x34a), region = 44  ;;  %s871_s16 = sshll.u32 (!%p232_p2), %s1231_s12, 3 }
  0x25   : > { %s238_s17 = scalar_lea.sflag (!%p232_p2), [#allocation4], %s1231_s12  ;;  %s241_s19 = scalar_lea.vmem (!%p232_p2), [#allocation3], %s871_s16 }
  0x29   : > { %1060 = dma.done.wait (%p1188_p6), %s238_s17, 128  }
  0x2a   : > { %1062 = vsyncadd (%p1188_p6), %s238_s17, 4294967168  ;;  %v1241_v0 = vld [vmem:[%s241_s19] sm:$0xff]  ;;  %vm1578_vm0 = vcmask 1043456   ;;  %v1083_v11 = vmov 256.0   ;;  %vm302_vm2 = vcmask 7168   ;;  %vm306_vm3 = vcmask 31744  }
  0x2b   : > { %273 = vst [vmem:[#allocation1] ss:$2 sm:$0xff] %v1241_v0  ;;  %969 = vrcp.f32 %v1083_v11  ;;  %v305_v21 = vld [vmem:[%s1575_s4] sm:$0x3]  ;;  %s304_s20 = sld [smem:[#allocation2]]  ;;  %vm342_vm5 = vcmask 1041408  }
  0x2c   : > { %v337_v26 = vld [vmem:[%s1576_s5] sm:$0xf]  ;;  %vm338_vm6 = vcmask 15360   ;;  %v1084_v28 = vmov 5   ;;  %vm366_vm7 = vcmask 11264   ;;  %v1085_v32 = vmov 1  }
  0x2d   : > { %957 = vset.pattern.permute.xlu1 %v1084_v28  ;;  %v1260_v31 = vld [vmem:[%s1572_s1] sm:$0x3]  ;;  %959 = vset.pattern.permute.xlu2 %v1085_v32  ;;  %v1086_v33 = vmov 4   ;;  %v1087_v36 = vmov 0   ;;  %v1088_v37 = vmov 2   ;;  %v1089_v38 = vmov 6  }
  0x2e   : > { %496 = vperm.xlu2 %959, %v1260_v31   ;;  %958 = vset.pattern.permute.xlu0 %v1087_v36  ;;  %v1090_v41 = vmov 3   ;;  %v1091_v42 = vmov 7   ;;  %v1092_v45 = vmov 839922192   ;;  %v1093_v49 = vmov 8   ;;  %s1095_s30 = smov 127  }
  0x2f   : > { %v391_v46 = vunpack.c.l.s4 %v1092_v45  ;;  %v1094_v59 = vmov 4.0   ;;  %vm444_vm13 = vcmask 1040384   ;;  %s1096_s13 = smov 3   ;;  %s1097_s8 = smov 5  }
  0x30   : > { %s1098_s14 = smov 126   ;;  %s1099_s15 = smov 2  }
  0x31   : > { %v970_v12 = vpop.eup %969  ;;  %v334_v23 = vstv %s304_s20  ;;  %v392_v52 = vunpack.c.0.s8 %v391_v46  ;;  %s1100_s17 = smov 125   ;;  %s1101_s19 = smov 1  }
  0x32   : > { %v274_v1 = vld.sshfl [vmem:[#allocation1] sm:$0xff pattern:$0x75316420]  ;;  %v275_v2 = vld.sshfl [vmem:[#allocation1 + $0x8] sm:$0xff pattern:$0x75316420]  ;;  %vm289_vm1 = vweird.f32 %v970_v12 }
  0x33   : > { %v279_v3 = vsel %vm1578_vm0, %v274_v1, 0.0  ;;  %v280_v4 = vsel %vm1578_vm0, %v275_v2, 0.0  ;;  %292 = vst [vmem:[#allocation1] ss:$2 sm:$0xff] %v1241_v0  ;;  %v285_v13 = vmul.f32 256.0, %v970_v12  ;;  %s1102_s9 = smov 4  }
  0x34   : > { %v281_v5 = vadd.f32 %v280_v4, %v279_v3  ;;  %s1103_s18 = smov 124   ;;  %s1106_s20 = smov 123  }
  0x35   : > { %v286_v14 = vsub.f32 1.0, %v285_v13  ;;  %s886_s27 = sshll.u32 %s1166_s0, 3  ;;  %s270_s0 = scalar_lea.vmem [#allocation6], %s871_s16 }
  0x36   : > { %282 = vadd.xlane.f32.xlu0 %v281_v5  ;;  %962 = vset.pattern.permute.xlu2 %v1086_v33 }
  0x37   : > { %v287_v15 = vmul.f32 %v970_v12, %v286_v14  ;;  %574 = vperm.xlu2 %962, %v1260_v31  }
  0x39   : > { %v288_v16 = vadd.f32 %v970_v12, %v287_v15 }
  0x3a   : > { %v293_v6 = vld.sshfl [vmem:[#allocation1] sm:$0xff pattern:$0x75316420]  ;;  %v294_v7 = vld.sshfl [vmem:[#allocation1 + $0x8] sm:$0xff pattern:$0x75316420] }
  0x3b   : > { %v297_v8 = vsel %vm1578_vm0, %v293_v6, -inf  ;;  %v298_v9 = vsel %vm1578_vm0, %v294_v7, -inf  ;;  %v290_v18 = vsel %vm289_vm1, %v970_v12, %v288_v16 }
  0x3c   : > { %v299_v10 = vmax.f32 %v297_v8, %v298_v9 }
  0x3e   : > { %300 = vmax.xlane.f32.xlu0 %v299_v10 }
  0x3f   : > { %963 = vset.pattern.permute.xlu2 %v1089_v38 }
  0x40   : > { %600 = vperm.xlu2 %963, %v1260_v31  }
  0x48   : > { %964 = vset.pattern.permute.xlu2 %v1091_v42 }
  0x49   : > { %626 = vperm.xlu2 %964, %v1260_v31  }
  0x51   : > { %965 = vset.pattern.permute.xlu2 %v1093_v49 }
  0x52   : > { %470 = vperm.xlu0 %958, %v1260_v31   ;;  %652 = vperm.xlu2 %965, %v1260_v31  }
  0x5a   : > { %961 = vset.pattern.permute.xlu0 %v1090_v41  ;;  %v1105_v41 = vmov 10  }
  0x5b   : > { %548 = vperm.xlu0 %961, %v1260_v31  }
  0x63   : > { %968 = vset.pattern.permute.xlu0 %v1105_v41 }
  0x88   : > { %v1302_v42 = vpop.permute.xlu2 %496 }
  0xa9   : > { %v283_v17 = vpop.xlane.xlu0 %282 }
  0xaa   : > { %v291_v19 = vmul.f32 %v290_v18, %v283_v17 }
  0xb1   : > { %v301_v20 = vpop.xlane.xlu0 %300 }
  0xb2   : > { %v303_v22 = vsel %vm302_vm2, %v291_v19, %v301_v20 }
  0xb3   : > { %873 = vmatpush.msk.msra.mxu0 %vm1578_vm0, %v303_v22 }
  0xb4   : > { %874 = vmatmul.msk.f32.vlgmr.msra.gmra.mxu0 %vm306_vm3, %v305_v21 }
 0x131   : > { %v330_v24 = vpop.f32.mrf.mxu0 }
 0x132   : > { %vm333_vm4 = vcmp.ge.f32.partialorder %v330_v24, 0.0  ;;  %v335_v25 = vmul.f32 %v334_v23, %v330_v24 }
 0x134   : > { %v336_v27 = vsel %vm333_vm4, %v330_v24, %v335_v25 }
 0x135   : > { %875 = vmatpush.msk.msra.mxu1 %vm342_vm5, %v336_v27 }
 0x136   : > { %876 = vmatmul.msk.f32.vlgmr.msra.gmra.mxu1 %vm338_vm6, %v337_v26 }
 0x1b3   : > { %v363_v29 = vpop.f32.mrf.mxu1 }
 0x1b4   : > { %v367_v30 = vsel %vm366_vm7, %v363_v29, 0.0 }
 0x1b5   : > { %368 = vadd.xlane.f32.xlu1 %v367_v30 }
 0x1ce   : > { %451 = vperm.xlu1 %957, %v1260_v31  }
 0x1d6   : > { %960 = vset.pattern.permute.xlu1 %v1088_v37 }
 0x1d7   : > { %522 = vperm.xlu1 %960, %v1260_v31  }
 0x228   : > { %v369_v34 = vpop.xlane.xlu1 %368 }
 0x229   : > { %v877_v35 = vmul.f32 -1.442695, %v369_v34 }
 0x22b   : > { %971 = vpow2.f32 %v877_v35 }
 0x231   : > { %v972_v39 = vpop.eup %971 }
 0x232   : > { %v373_v40 = vadd.f32 1.0, %v972_v39 }
 0x234   : > { %973 = vrcp.f32 %v373_v40  ;;  %v385_v48 = vand.u32 2147483648, %v373_v40  ;;  %v383_v51 = vand.u32 2147483647, %v373_v40  ;;  %vm379_vm9 = vweird.f32 %v373_v40 }
 0x235   : > { %975 = vrcp.f32 %v1094_v59 }
 0x236   : > { %v386_v54 = vor.u32 1.1754944e-38, %v385_v48  ;;  %vm384_vm11 = vcmp.eq.f32.partialorder %v383_v51, 8.507059e+37  ;;  %v1322_v51 = vld [vmem:[%s1573_s2] sm:$0x3] }
 0x237   : > { %v517_v59 = vadd.s32 4294967293, %v1322_v51 }
 0x239   : > { %vm518_vm4 = vcmp.ge.s32.totalorder %v517_v59, 0  ;;  %vm519_vm6 = vcmp.lt.s32.totalorder %v517_v59, 16 }
 0x23a   : > { %v974_v43 = vpop.eup %973 }
 0x23b   : > { %v375_v44 = vmul.f32 %v974_v43, %v373_v40  ;;  %vm380_vm8 = vweird.f32 %v974_v43  ;;  %v976_v60 = vpop.eup %975  ;;  %v1104_v40 = vmov 9  }
 0x23c   : > { %vm381_vm10 = vmor %vm379_vm9, %vm380_vm8  ;;  %v417_v2 = vmul.f32 4.0, %v976_v60  ;;  %vm421_vm12 = vweird.f32 %v976_v60  ;;  %966 = vset.pattern.permute.xlu2 %v1104_v40 }
 0x23d   : > { %v376_v47 = vsub.f32 1.0, %v375_v44 }
 0x23f   : > { %v377_v50 = vmul.f32 %v974_v43, %v376_v47 }
 0x240   : > { %v452_v48 = vpop.permute.xlu1 %451 }
 0x241   : > { %v378_v53 = vadd.f32 %v974_v43, %v377_v50 }
 0x243   : > { %v382_v55 = vsel %vm381_vm10, %v974_v43, %v378_v53  ;;  %v1306_v43 = vpop.permute.xlu2 %574  ;;  %v465_v53 = vadd.s32 4294967291, %v1322_v51 }
 0x244   : > { %v387_v56 = vsel %vm384_vm11, %v386_v54, %v382_v55  ;;  %v471_v54 = vpop.permute.xlu0 %470  ;;  %vm520_vm11 = vmand %vm518_vm4, %vm519_vm6 }
 0x245   : > { %v393_v57 = vperm.slane %v387_v56, %v392_v52  ;;  %vm466_vm14 = vcmp.ge.s32.totalorder %v465_v53, 0  ;;  %vm467_vm15 = vcmp.lt.s32.totalorder %v465_v53, 16  ;;  %v491_v56 = vadd.s32 4294967292, %v1322_v51 }
 0x246   : > { %vm468_vm1 = vmand %vm466_vm14, %vm467_vm15 }
 0x247   : > { %v1273_v58 = vmul.f32 %v393_v57, %v1241_v0  ;;  %v418_v0 = vsub.f32 1.0, %v417_v2  ;;  %vm492_vm2 = vcmp.ge.s32.totalorder %v491_v56, 0  ;;  %vm493_vm3 = vcmp.lt.s32.totalorder %v491_v56, 16 }
 0x248   : > { %vm494_vm10 = vmand %vm492_vm2, %vm493_vm3 }
 0x249   : > { %397 = vst [vmem:[#allocation1] ss:$2 sm:$0xff] %v1273_v58  ;;  %v419_v13 = vmul.f32 %v976_v60, %v418_v0  ;;  %v1317_v50 = vpop.permute.xlu1 %522  ;;  %v527_v0 = vsel %vm520_vm11, 1, %v1087_v36 }
 0x24b   : > { %v420_v22 = vadd.f32 %v976_v60, %v419_v13  ;;  %v1310_v44 = vpop.permute.xlu2 %600 }
 0x24d   : > { %v422_v29 = vsel %vm421_vm12, %v976_v60, %v420_v22  ;;  %v543_v60 = vadd.s32 4294967294, %v1322_v51 }
 0x24f   : > { %vm544_vm7 = vcmp.ge.s32.totalorder %v543_v60, 0  ;;  %vm545_vm8 = vcmp.lt.s32.totalorder %v543_v60, 16 }
 0x250   : > { %v398_v61 = vld.sshfl [vmem:[#allocation1] sm:$0xff pattern:$0x75316420]  ;;  %v399_v62 = vld.sshfl [vmem:[#allocation1 + $0x8] sm:$0xff pattern:$0x75316420]  ;;  %vm546_vm12 = vmand %vm544_vm7, %vm545_vm8 }
 0x251   : > { %v402_v63 = vsel %vm1578_vm0, %v398_v61, 0.0  ;;  %v409_v1 = vsel %vm1578_vm0, %v399_v62, 0.0  ;;  %425 = vst [vmem:[#allocation1] ss:$2 sm:$0xff] %v1273_v58  ;;  %v475_v62 = vsel %vm468_vm1, 1, %v1087_v36 }
 0x252   : > { %v403_v3 = vrot.slane %v402_v63, 4  ;;  %v410_v4 = vrot.slane %v409_v1, 4  ;;  %v476_v2 = vperm.slane %v475_v62, 0 }
 0x253   : > { %v1313_v45 = vpop.permute.xlu2 %626 }
 0x254   : > { %v404_v5 = vadd.f32 %v403_v3, %v402_v63  ;;  %v411_v6 = vadd.f32 %v410_v4, %v409_v1  ;;  %v1335_v63 = vpop.permute.xlu0 %548 }
 0x256   : > { %v405_v7 = vrot.slane %v404_v5, 2  ;;  %v412_v8 = vrot.slane %v411_v6, 2 }
 0x258   : > { %v406_v9 = vadd.f32 %v405_v7, %v404_v5  ;;  %v413_v10 = vadd.f32 %v412_v8, %v411_v6  ;;  %v426_v11 = vld.sshfl [vmem:[#allocation1] sm:$0xff pattern:$0x75316420]  ;;  %v427_v12 = vld.sshfl [vmem:[#allocation1 + $0x8] sm:$0xff pattern:$0x75316420] }
 0x259   : > { %v430_v14 = vsel %vm1578_vm0, %v426_v11, -inf  ;;  %v437_v15 = vsel %vm1578_vm0, %v427_v12, -inf  ;;  %v501_v5 = vsel %vm494_vm10, 1, %v1087_v36  ;;  %v569_v6 = vadd.s32 4294967295, %v1322_v51 }
 0x25a   : > { %v431_v16 = vrot.slane %v430_v14, 4  ;;  %v438_v17 = vrot.slane %v437_v15, 4  ;;  %v407_v18 = vrot.slane %v406_v9, 1  ;;  %v414_v19 = vrot.slane %v413_v10, 1 }
 0x25b   : > { %v1315_v46 = vpop.permute.xlu2 %652  ;;  %v477_v7 = vperm.slane %v475_v62, 1  ;;  %v502_v13 = vperm.slane %v501_v5, 0  ;;  %vm570_vm14 = vcmp.ge.s32.totalorder %v569_v6, 0  ;;  %vm571_vm15 = vcmp.lt.s32.totalorder %v569_v6, 16 }
 0x25c   : > { %v432_v20 = vmax.f32 %v430_v14, %v431_v16  ;;  %v439_v21 = vmax.f32 %v437_v15, %v438_v17  ;;  %v408_v25 = vadd.f32 %v407_v18, %v406_v9  ;;  %v415_v26 = vadd.f32 %v414_v19, %v413_v10  ;;  %vm572_vm7 = vmand %vm570_vm14, %vm571_vm15 }
 0x25d   : > { %v553_v9 = vsel %vm546_vm12, 1, %v1087_v36  ;;  %v595_v10 = vadd.s32 1, %v1322_v51  ;;  %v503_v14 = vperm.slane %v501_v5, 1  ;;  %v528_v15 = vperm.slane %v527_v0, 0 }
 0x25e   : > { %v433_v23 = vrot.slane %v432_v20, 2  ;;  %v440_v24 = vrot.slane %v439_v21, 2  ;;  %v423_v33 = vmul.f32 %v422_v29, %v408_v25  ;;  %v424_v34 = vmul.f32 %v422_v29, %v415_v26 }
 0x25f   : > { %v529_v16 = vperm.slane %v527_v0, 1  ;;  %vm596_vm2 = vcmp.ge.s32.totalorder %v595_v10, 0  ;;  %vm597_vm3 = vcmp.lt.s32.totalorder %v595_v10, 16  ;;  %vm1354_vm4 = vcmp.eq.s32.totalorder %v477_v7, 1 }
 0x260   : > { %v434_v27 = vmax.f32 %v432_v20, %v433_v23  ;;  %v441_v28 = vmax.f32 %v439_v21, %v440_v24  ;;  %v554_v20 = vperm.slane %v553_v9, 0  ;;  %v555_v23 = vperm.slane %v553_v9, 1 }
 0x261   : > { %vm1360_vm6 = vcmp.eq.s32.totalorder %v502_v13, 1  ;;  %vm1367_vm8 = vcmp.eq.s32.totalorder %v503_v14, 1  ;;  %vm1372_vm10 = vcmp.eq.s32.totalorder %v528_v15, 1  ;;  %vm1376_vm11 = vcmp.eq.s32.totalorder %v529_v16, 1 }
 0x262   : > { %v435_v30 = vrot.slane %v434_v27, 1  ;;  %v442_v32 = vrot.slane %v441_v28, 1  ;;  %vm1390_vm14 = vcmp.eq.s32.totalorder %v554_v20, 1  ;;  %vm1394_vm15 = vcmp.eq.s32.totalorder %v555_v23, 1 }
 0x264   : > { %v436_v35 = vmax.f32 %v434_v27, %v435_v30  ;;  %v443_v37 = vmax.f32 %v441_v28, %v442_v32  ;;  %v621_v28 = vadd.s32 2, %v1322_v51 }
 0x266   : > { %v1281_v38 = vsel %vm444_vm13, %v423_v33, %v436_v35  ;;  %v1283_v39 = vsel %vm444_vm13, %v424_v34, %v443_v37  ;;  %vm1343_vm13 = vcmp.eq.s32.totalorder %v476_v2, 1  ;;  %v647_v35 = vadd.s32 3, %v1322_v51 }
 0x267   : > { %590 = vrot.lane.b32.xlu0 %v1283_v39, %s1095_s30  ;;  %510 = vrot.lane.b32.xlu1 %v1281_v38, %s1096_s13  ;;  %v454_v17 = vmul.f32 %v452_v48, %v1281_v38  ;;  %v455_v18 = vmul.f32 %v452_v48, %v1283_v39 }
 0x268   : > { %456 = vrot.lane.b32.xlu2 %v1281_v38, %s1097_s8  ;;  %vm649_vm0 = vcmp.lt.s32.totalorder %v647_v35, 16 }
 0x26f   : > { %616 = vrot.lane.b32.xlu0 %v1283_v39, %s1098_s14  ;;  %538 = vrot.lane.b32.xlu1 %v1283_v39, %s1099_s15 }
 0x270   : > { %458 = vrot.lane.b32.xlu2 %v1283_v39, %s1097_s8  ;;  %s791_s8 = sshll.u32 %s270_s0, 4  ;;  %s792_s8 = int_to_ptr.vmem [resolvable:$true] %s791_s8 }
 0x277   : > { %642 = vrot.lane.b32.xlu0 %v1283_v39, %s1100_s17  ;;  %564 = vrot.lane.b32.xlu1 %v1283_v39, %s1101_s19 }
 0x278   : > { %484 = vrot.lane.b32.xlu2 %v1281_v38, %s1102_s9 }
 0x27f   : > { %668 = vrot.lane.b32.xlu0 %v1283_v39, %s1103_s18  ;;  %588 = vrot.lane.b32.xlu1 %v1281_v38, %s1095_s30 }
 0x280   : > { %486 = vrot.lane.b32.xlu2 %v1283_v39, %s1102_s9 }
 0x287   : > { %694 = vrot.lane.b32.xlu0 %v1283_v39, %s1106_s20  ;;  %614 = vrot.lane.b32.xlu1 %v1281_v38, %s1098_s14 }
 0x288   : > { %512 = vrot.lane.b32.xlu2 %v1283_v39, %s1096_s13  ;;  %s789_s13 = scalar_lea.hbm %s1577_s6, %s886_s27 }
 0x289   : > { %s793_s14 = sshll.u32 %s789_s13, 4  ;;  %s794_s14 = int_to_ptr.hbm [resolvable:$true] %s793_s14 }
 0x28f   : > { %640 = vrot.lane.b32.xlu1 %v1281_v38, %s1100_s17  ;;  %s1029_s17 = sshra.s32 %s794_s14, 4  ;;  %s1030_s17 = int_to_ptr.hbm [resolvable:$true] %s1029_s17 }
 0x290   : > { %536 = vrot.lane.b32.xlu2 %v1281_v38, %s1099_s15  ;;  %s778_s15 = scalar_lea.sflag [#allocation5], %s1231_s12  ;;  %p1036_p0 = scmp.lt.s32.totalorder %s1030_s17, %s1577_s6 }
 0x297   : > { %666 = vrot.lane.b32.xlu1 %v1281_v38, %s1103_s18  ;;  %s1035_s18 = scalar_lea.hbm %s1577_s6, 16 }
 0x298   : > { %562 = vrot.lane.b32.xlu2 %v1281_v38, %s1101_s19  ;;  %s1031_s19 = scalar_lea.hbm %s1030_s17, 8 }
 0x299   : > { %p1032_p6 = scmp.ne.s32.totalorder %s1030_s17, %s1031_s19  ;;  %p1037_p1 = scmp.lt.s32.totalorder %s1035_s18, %s1031_s19 }
 0x29b   : > { %p1033_p9 = pnand %p1032_p6, %p1195_p11  ;;  %p1038_p3 = por %p1037_p1, %p1036_p0 }
 0x29d   : > { %p1034_p13 = pneg %p1033_p9 }
 0x29f   : > { %692 = vrot.lane.b32.xlu1 %v1281_v38, %s1106_s20  ;;  %p1039_p4 = pnand %p1038_p3, %p1034_p13 }
 0x2a0   : > { %678 = vperm.xlu2 %966, %v1260_v31  }
 0x2a8   : > { %967 = vset.pattern.permute.xlu2 %v1105_v41  ;;  %v579_v41 = vsel %vm572_vm7, 1, %v1087_v36 }
 0x2a9   : > { %704 = vperm.xlu2 %967, %v1260_v31   ;;  %v460_v31 = vlaneseq }
 0x2ab   : > { %v1332_v61 = vand.u32 127, %v460_v31  ;;  %v581_v31 = vperm.slane %v579_v41, 1 }
 0x2ad   : > { %vm462_vm9 = vcmp.lt.s32.totalorder %v1332_v61, 5  ;;  %vm488_vm1 = vcmp.lt.s32.totalorder %v1332_v61, 4  ;;  %vm540_vm12 = vcmp.lt.s32.totalorder %v1332_v61, 2 }
 0x2c2   : > { %v457_v47 = vpop.permute.xlu2 %456 }
 0x2ca   : > { %v459_v49 = vpop.permute.xlu2 %458 }
 0x2cb   : > { %v464_v4 = vsel %vm462_vm9, %v459_v49, %v457_v47  ;;  %v463_v11 = vsel %vm462_vm9, %v457_v47, %v459_v49  ;;  %vm514_vm9 = vcmp.lt.s32.totalorder %v1332_v61, 3 }
 0x2cc   : > { %v473_v12 = vmul.f32 %v471_v54, %v464_v4  ;;  %v474_v22 = vmul.f32 %v471_v54, %v463_v11  ;;  %v580_v54 = vperm.slane %v579_v41, 0 }
 0x2ce   : > { %v480_v26 = vsel %vm1343_vm13, %v473_v12, 0.0  ;;  %vm598_vm13 = vmand %vm596_vm2, %vm597_vm3  ;;  %v481_v37 = vsel %vm1354_vm4, %v474_v22, 0.0  ;;  %vm623_vm2 = vcmp.lt.s32.totalorder %v621_v28, 16  ;;  %vm566_vm3 = vcmp.lt.s32.totalorder %v1332_v61, 1 }
 0x2cf   : > { %v482_v38 = vadd.f32 %v480_v26, %v454_v17  ;;  %v605_v53 = vsel %vm598_vm13, 1, %v1087_v36  ;;  %vm648_vm4 = vcmp.ge.s32.totalorder %v647_v35, 0  ;;  %v483_v62 = vadd.f32 %v481_v37, %v455_v18 }
 0x2d0   : > { %v607_v4 = vperm.slane %v605_v53, 1  ;;  %vm618_vm13 = vcmp.lt.s32.totalorder %v1332_v61, 126  ;;  %v673_v37 = vadd.s32 4, %v1322_v51 }
 0x2d2   : > { %v1324_v52 = vpop.permute.xlu2 %484 }
 0x2d9   : > { %v1327_v55 = vpop.permute.xlu1 %510  ;;  %v1352_v19 = vpop.permute.xlu0 %590 }
 0x2da   : > { %v487_v57 = vpop.permute.xlu2 %486 }
 0x2db   : > { %v489_v33 = vsel %vm488_vm1, %v1324_v52, %v487_v57  ;;  %v490_v34 = vsel %vm488_vm1, %v487_v57, %v1324_v52  ;;  %vm622_vm1 = vcmp.ge.s32.totalorder %v621_v28, 0 }
 0x2dc   : > { %v499_v49 = vmul.f32 %v1302_v42, %v490_v34  ;;  %v500_v52 = vmul.f32 %v1302_v42, %v489_v33  ;;  %vm624_vm7 = vmand %vm622_vm1, %vm623_vm2 }
 0x2dd   : > { %v631_v9 = vsel %vm624_vm7, 1, %v1087_v36 }
 0x2de   : > { %v507_v5 = vsel %vm1367_vm8, %v500_v52, 0.0  ;;  %vm1437_vm8 = vcmp.eq.s32.totalorder %v581_v31, 1  ;;  %v632_v17 = vperm.slane %v631_v9, 0  ;;  %v633_v18 = vperm.slane %v631_v9, 1 }
 0x2df   : > { %v509_v13 = vadd.f32 %v507_v5, %v483_v62 }
 0x2e1   : > { %v1338_v1 = vpop.permute.xlu1 %538  ;;  %v617_v2 = vpop.permute.xlu0 %616 }
 0x2e2   : > { %v513_v3 = vpop.permute.xlu2 %512 }
 0x2e3   : > { %v515_v47 = vsel %vm514_vm9, %v1327_v55, %v513_v3  ;;  %v516_v48 = vsel %vm514_vm9, %v513_v3, %v1327_v55  ;;  %vm592_vm9 = vcmp.lt.s32.totalorder %v1332_v61, 127  ;;  %v606_v3 = vperm.slane %v605_v53, 0 }
 0x2e4   : > { %v525_v57 = vmul.f32 %v1317_v50, %v516_v48  ;;  %v526_v59 = vmul.f32 %v1317_v50, %v515_v47  ;;  %v506_v50 = vsel %vm1360_vm6, %v499_v49, 0.0  ;;  %vm650_vm6 = vmand %vm648_vm4, %vm649_vm0  ;;  %vm1467_vm0 = vcmp.eq.s32.totalorder %v607_v4, 1 }
 0x2e5   : > { %vm1444_vm1 = vcmp.eq.s32.totalorder %v606_v3, 1  ;;  %v657_v20 = vsel %vm650_vm6, 1, %v1087_v36  ;;  %vm675_vm4 = vcmp.lt.s32.totalorder %v673_v37, 16  ;;  %vm670_vm6 = vcmp.lt.s32.totalorder %v1332_v61, 124 }
 0x2e6   : > { %v532_v10 = vsel %vm1372_vm10, %v525_v57, 0.0  ;;  %v533_v11 = vsel %vm1376_vm11, %v526_v59, 0.0  ;;  %v658_v33 = vperm.slane %v657_v20, 0  ;;  %vm1476_vm10 = vcmp.eq.s32.totalorder %v632_v17, 1 }
 0x2e7   : > { %v535_v22 = vadd.f32 %v533_v11, %v509_v13  ;;  %vm1480_vm11 = vcmp.eq.s32.totalorder %v633_v18, 1 }
 0x2e9   : > { %v565_v21 = vpop.permute.xlu1 %564 }
 0x2ea   : > { %v537_v24 = vpop.permute.xlu2 %536 }
 0x2eb   : > { %v541_v55 = vsel %vm540_vm12, %v537_v24, %v1338_v1  ;;  %v542_v42 = vsel %vm540_vm12, %v1338_v1, %v537_v24  ;;  %vm1426_vm12 = vcmp.eq.s32.totalorder %v580_v54, 1 }
 0x2ec   : > { %v551_v0 = vmul.f32 %v1335_v63, %v542_v42  ;;  %v552_v7 = vmul.f32 %v1335_v63, %v541_v55  ;;  %v508_v63 = vadd.f32 %v506_v50, %v482_v38  ;;  %v643_v38 = vpop.permute.xlu0 %642 }
 0x2ee   : > { %v558_v23 = vsel %vm1390_vm14, %v551_v0, 0.0  ;;  %v559_v24 = vsel %vm1394_vm15, %v552_v7, 0.0  ;;  %vm644_vm14 = vcmp.lt.s32.totalorder %v1332_v61, 125  ;;  %vm1485_vm15 = vcmp.eq.s32.totalorder %v658_v33, 1 }
 0x2ef   : > { %v561_v35 = vadd.f32 %v559_v24, %v535_v22 }
 0x2f1   : > { %v589_v56 = vpop.permute.xlu1 %588 }
 0x2f2   : > { %v563_v60 = vpop.permute.xlu2 %562  ;;  %v594_v26 = vsel %vm592_vm9, %v1352_v19, %v589_v56 }
 0x2f3   : > { %v567_v6 = vsel %vm566_vm3, %v563_v60, %v565_v21  ;;  %v568_v1 = vsel %vm566_vm3, %v565_v21, %v563_v60  ;;  %v534_v21 = vadd.f32 %v532_v10, %v508_v63  ;;  %v604_v40 = vmul.f32 %v1310_v44, %v594_v26 }
 0x2f4   : > { %v577_v14 = vmul.f32 %v1306_v43, %v568_v1  ;;  %v578_v15 = vmul.f32 %v1306_v43, %v567_v6  ;;  %v593_v43 = vsel %vm592_vm9, %v589_v56, %v1352_v19  ;;  %v659_v19 = vperm.slane %v657_v20, 1  ;;  %v669_v8 = vpop.permute.xlu0 %668 }
 0x2f5   : > { %v560_v34 = vadd.f32 %v558_v23, %v534_v21  ;;  %v603_v39 = vmul.f32 %v1310_v44, %v593_v43  ;;  %vm674_vm3 = vcmp.ge.s32.totalorder %v673_v37, 0  ;;  %v611_v56 = vsel %vm1467_vm0, %v604_v40, 0.0 }
 0x2f6   : > { %v584_v29 = vsel %vm1426_vm12, %v577_v14, 0.0  ;;  %v585_v30 = vsel %vm1437_vm8, %v578_v15, 0.0  ;;  %vm1489_vm2 = vcmp.eq.s32.totalorder %v659_v19, 1  ;;  %vm676_vm7 = vmand %vm674_vm3, %vm675_vm4  ;;  %vm696_vm0 = vcmp.lt.s32.totalorder %v1332_v61, 123 }
 0x2f7   : > { %v586_v48 = vadd.f32 %v584_v29, %v560_v34  ;;  %v587_v49 = vadd.f32 %v585_v30, %v561_v35  ;;  %v610_v31 = vsel %vm1444_vm1, %v603_v39, 0.0 }
 0x2f9   : > { %v615_v25 = vpop.permute.xlu1 %614  ;;  %v612_v42 = vadd.f32 %v610_v31, %v586_v48  ;;  %v613_v60 = vadd.f32 %v611_v56, %v587_v49 }
 0x2fa   : > { %v619_v27 = vsel %vm618_vm13, %v615_v25, %v617_v2  ;;  %v620_v28 = vsel %vm618_vm13, %v617_v2, %v615_v25  ;;  %v679_v7 = vpop.permute.xlu2 %678 }
 0x2fb   : > { %v629_v41 = vmul.f32 %v1313_v45, %v619_v27  ;;  %v630_v47 = vmul.f32 %v1313_v45, %v620_v28  ;;  %v699_v45 = vadd.s32 5, %v1322_v51 }
 0x2fc   : > { %v695_v22 = vpop.permute.xlu0 %694 }
 0x2fd   : > { %v636_v57 = vsel %vm1476_vm10, %v629_v41, 0.0  ;;  %v637_v59 = vsel %vm1480_vm11, %v630_v47, 0.0  ;;  %vm700_vm9 = vcmp.ge.s32.totalorder %v699_v45, 0  ;;  %vm701_vm12 = vcmp.lt.s32.totalorder %v699_v45, 16 }
 0x2fe   : > { %v638_v4 = vadd.f32 %v636_v57, %v612_v42  ;;  %v639_v50 = vadd.f32 %v637_v59, %v613_v60  ;;  %vm702_vm8 = vmand %vm700_vm9, %vm701_vm12  ;;  %vm1622_vm12 = vcmask 1043456  }
 0x2ff   : > { %v709_v13 = vsel %vm702_vm8, 1, %v1087_v36 }
 0x300   : > { %v710_v18 = vperm.slane %v709_v13, 0  ;;  %v711_v20 = vperm.slane %v709_v13, 1 }
 0x301   : > { %v641_v55 = vpop.permute.xlu1 %640 }
 0x302   : > { %v645_v62 = vsel %vm644_vm14, %v641_v55, %v643_v38  ;;  %v646_v2 = vsel %vm644_vm14, %v643_v38, %v641_v55  ;;  %vm712_vm10 = vcmp.eq.s32.totalorder %v710_v18, 1  ;;  %vm713_vm11 = vcmp.eq.s32.totalorder %v711_v20, 1 }
 0x303   : > { %v655_v3 = vmul.f32 %v1315_v46, %v645_v62  ;;  %v656_v51 = vmul.f32 %v1315_v46, %v646_v2  ;;  %v683_v46 = vsel %vm676_vm7, 1, %v1087_v36  ;;  %v705_v21 = vpop.permute.xlu2 %704 }
 0x304   : > { %v684_v10 = vperm.slane %v683_v46, 0  ;;  %v685_v11 = vperm.slane %v683_v46, 1 }
 0x305   : > { %v662_v5 = vsel %vm1485_vm15, %v655_v3, 0.0  ;;  %v663_v6 = vsel %vm1489_vm2, %v656_v51, 0.0 }
 0x306   : > { %v664_v1 = vadd.f32 %v662_v5, %v638_v4  ;;  %v665_v0 = vadd.f32 %v663_v6, %v639_v50  ;;  %vm1513_vm13 = vcmp.eq.s32.totalorder %v684_v10, 1  ;;  %vm1517_vm1 = vcmp.eq.s32.totalorder %v685_v11, 1 }
 0x309   : > { %v667_v9 = vpop.permute.xlu1 %666 }
 0x30a   : > { %v671_v12 = vsel %vm670_vm6, %v667_v9, %v669_v8  ;;  %v672_v63 = vsel %vm670_vm6, %v669_v8, %v667_v9 }
 0x30b   : > { %v681_v14 = vmul.f32 %v679_v7, %v671_v12  ;;  %v682_v15 = vmul.f32 %v679_v7, %v672_v63 }
 0x30d   : > { %v688_v23 = vsel %vm1513_vm13, %v681_v14, 0.0  ;;  %v689_v36 = vsel %vm1517_vm1, %v682_v15, 0.0 }
 0x30e   : > { %v690_v28 = vadd.f32 %v688_v23, %v664_v1  ;;  %v691_v29 = vadd.f32 %v689_v36, %v665_v0 }
 0x311   : > { %v693_v24 = vpop.permute.xlu1 %692 }
 0x312   : > { %v697_v25 = vsel %vm696_vm0, %v693_v24, %v695_v22  ;;  %v698_v43 = vsel %vm696_vm0, %v695_v22, %v693_v24 }
 0x313   : > { %v707_v26 = vmul.f32 %v705_v21, %v697_v25  ;;  %v708_v27 = vmul.f32 %v705_v21, %v698_v43 }
 0x315   : > { %v714_v30 = vsel %vm712_vm10, %v707_v26, 0.0  ;;  %v715_v32 = vsel %vm713_vm11, %v708_v27, 0.0 }
 0x316   : > { %v716_v61 = vadd.f32 %v714_v30, %v690_v28  ;;  %v717_v33 = vadd.f32 %v715_v32, %v691_v29 }
 0x318   : > { %v718_v34 = vsel %vm342_vm5, %v716_v61, 0.0  ;;  %v725_v35 = vsel %vm342_vm5, %v717_v33, 0.0 }
 0x319   : > { %v719_v19 = vrot.slane %v718_v34, 4  ;;  %v726_v37 = vrot.slane %v725_v35, 4 }
 0x31b   : > { %v720_v38 = vadd.f32 %v719_v19, %v718_v34  ;;  %v727_v39 = vadd.f32 %v726_v37, %v725_v35 }
 0x31d   : > { %v721_v40 = vrot.slane %v720_v38, 2  ;;  %v728_v41 = vrot.slane %v727_v39, 2 }
 0x31f   : > { %v722_v47 = vadd.f32 %v721_v40, %v720_v38  ;;  %v729_v48 = vadd.f32 %v728_v41, %v727_v39 }
 0x321   : > { %v723_v49 = vrot.slane %v722_v47, 1  ;;  %v730_v52 = vrot.slane %v729_v48, 1 }
 0x323   : > { %v724_v53 = vadd.f32 %v723_v49, %v722_v47  ;;  %v731_v54 = vadd.f32 %v730_v52, %v729_v48 }
 0x325   : > { %v878_v44 = vmul.f32 -1.442695, %v724_v53  ;;  %v879_v45 = vmul.f32 -1.442695, %v731_v54 }
 0x327   : > { %977 = vpow2.f32 %v878_v44 }
 0x328   : > { %979 = vpow2.f32 %v879_v45 }
 0x32d   : > { %v978_v31 = vpop.eup %977 }
 0x32e   : > { %v980_v56 = vpop.eup %979  ;;  %v738_v57 = vadd.f32 1.0, %v978_v31 }
 0x32f   : > { %v739_v59 = vadd.f32 1.0, %v980_v56 }
 0x330   : > { %981 = vrcp.f32 %v738_v57  ;;  %vm745_vm15 = vweird.f32 %v738_v57  ;;  %v751_v1 = vand.u32 2147483648, %v738_v57  ;;  %v749_v7 = vand.u32 2147483647, %v738_v57 }
 0x331   : > { %983 = vrcp.f32 %v739_v59  ;;  %v766_v4 = vand.u32 2147483648, %v739_v59  ;;  %v764_v5 = vand.u32 2147483647, %v739_v59  ;;  %vm760_vm3 = vweird.f32 %v739_v59 }
 0x332   : > { %v752_v11 = vor.u32 1.1754944e-38, %v751_v1  ;;  %vm750_vm9 = vcmp.eq.f32.partialorder %v749_v7, 8.507059e+37 }
 0x333   : > { %v767_v46 = vor.u32 1.1754944e-38, %v766_v4  ;;  %vm765_vm7 = vcmp.eq.f32.partialorder %v764_v5, 8.507059e+37 }
 0x336   : > { %v982_v55 = vpop.eup %981 }
 0x337   : > { %v984_v42 = vpop.eup %983  ;;  %v741_v60 = vmul.f32 %v982_v55, %v738_v57  ;;  %vm746_vm5 = vweird.f32 %v982_v55 }
 0x338   : > { %v756_v62 = vmul.f32 %v984_v42, %v739_v59  ;;  %vm761_vm14 = vweird.f32 %v984_v42  ;;  %vm1529_vm2 = vmor %vm745_vm15, %vm746_vm5 }
 0x339   : > { %v742_v2 = vsub.f32 1.0, %v741_v60  ;;  %vm762_vm4 = vmor %vm760_vm3, %vm761_vm14 }
 0x33a   : > { %v757_v3 = vsub.f32 1.0, %v756_v62 }
 0x33b   : > { %v743_v51 = vmul.f32 %v982_v55, %v742_v2 }
 0x33c   : > { %v758_v50 = vmul.f32 %v984_v42, %v757_v3 }
 0x33d   : > { %v744_v6 = vadd.f32 %v982_v55, %v743_v51 }
 0x33e   : > { %v759_v8 = vadd.f32 %v984_v42, %v758_v50 }
 0x33f   : > { %v748_v9 = vsel %vm1529_vm2, %v982_v55, %v744_v6 }
 0x340   : > { %v763_v10 = vsel %vm762_vm4, %v984_v42, %v759_v8  ;;  %v753_v13 = vsel %vm750_vm9, %v752_v11, %v748_v9 }
 0x341   : > { %v768_v12 = vsel %vm765_vm7, %v767_v46, %v763_v10 }
 0x342   : > { %v772_v63 = vrot.slane %v768_v12, 4 }
 0x344   : > { %v773_v14 = vsel %vm1622_vm12, %v753_v13, %v772_v63 }
 0x345   : > { %v775_v15 = vmul.f32 %v773_v14, %v1273_v58 }
 0x347   : > { %776 = vst [vmem:[%s270_s0] sm:$0xff] %v775_v15 }
 0x348   : > { %1042 = shalt.err (!%p1039_p4)
}
 0x349   : > { %889 = dma.vmem_to_hbm [thread:$0]  (%p1195_p11), %s792_s8, 128, %s794_s14, %s778_s15  }
 0x34a PF: > { %s805_s12 = sand.u32 1, %s1069_s23   ;;  %p1623_p7 = scmp.ge.s32.totalorder %s1081_s26, 2 }
 0x34b   : > { %s806_s22 = scalar_lea.sflag [#allocation5], %s805_s12 }
 0x34c   : > { %p896_p5 = pnand %p1623_p7, %p1199_p12 }
 0x34e   : > { %p897_p8 = pneg %p896_p5 }
 0x350   : > { %1064 = dma.done.wait (%p897_p8), %s806_s22, 128  }
 0x351   : > { %1066 = vsyncadd (%p897_p8), %s806_s22, 4294967168  ;;  %p20_p10 = scmp.ge.s32.totalorder %s1170_s28, 4   ;;  %s1624_s23 = smov %s1073_s24 }
 0x352   : > { %s1625_s24 = smov %s1077_s25  ;;  %s1626_s25 = smov %s1182_s7 }
 0x353   : > { %s1627_s26 = smov %s1170_s28  ;;  %22 = sbr.rel (!%p20_p10) target bundleno = 7 (0x7), region = 89 }
 0x358   :  { %812 = vsyncpa [#allocation4], 1 }
 0x359   :  { %814 = vsyncpa [#allocation4 + $0x1], 1 }
 0x35a   :  { %815 = vsyncpa [#allocation5], 1 }
 0x35b   :  { %817 = vsyncpa [#allocation5 + $0x1], 1 }

</bundles_post_ra>
